<compile_context>
chip_gen: v7x
topology: tpu7x:2x2x1
jax: 0.10.0
libtpu: 0.0.40
codegen_flags: <defaults>
</compile_context>

<pallas_src>
import jax
import jax.numpy as jnp
from jax.experimental import pallas as pl
from jax.experimental.pallas import tpu as pltpu


HIDDEN_PAD = 128   # lane-dense padded hidden width (logical hidden = 32)
OUT_PAD = 128      # lane-dense padded output width (logical out_dim = 1)


def central_critic_kernel(s_ref, a_ref, w1s_ref, w1a_ref, b1_ref,
                          w2_ref, b2_ref, w3_ref, b3_ref, o_ref):
    """Fused Linear->Tanh->Linear->Tanh->Linear on one batch tile.

    Layer 1 is a split matmul (states / actions kept as separate inputs, W1
    split at setup) so no [B, S+A] concat is ever materialised in HBM.
    bf16 operands feed the MXU; accumulation, bias adds and tanh stay f32.
    """
    z1 = (jnp.dot(s_ref[...], w1s_ref[...], preferred_element_type=jnp.float32)
          + jnp.dot(a_ref[...], w1a_ref[...], preferred_element_type=jnp.float32)
          + b1_ref[...])
    h1 = jnp.tanh(z1).astype(w2_ref.dtype)

    z2 = jnp.dot(h1, w2_ref[...], preferred_element_type=jnp.float32) + b2_ref[...]
    h2 = jnp.tanh(z2).astype(w3_ref.dtype)

    o_ref[...] = (jnp.dot(h2, w3_ref[...], preferred_element_type=jnp.float32)
                  + b3_ref[...]).astype(o_ref.dtype)


def _round_up(x, m):
    return (x + m - 1) // m * m


def init_params(key, in_features, hidden_size, out_features=1):
    """PyTorch-style Linear init, stored as (in_features, out_features), f32."""
    dims = [(in_features, hidden_size),
            (hidden_size, hidden_size),
            (hidden_size, out_features)]
    params = []
    for fan_in, fan_out in dims:
        key, kw, kb = jax.random.split(key, 3)
        bound = 1.0 / (fan_in ** 0.5)
        w = jax.random.uniform(kw, (fan_in, fan_out), jnp.float32,
                               minval=-bound, maxval=bound)
        b = jax.random.uniform(kb, (fan_out,), jnp.float32,
                               minval=-bound, maxval=bound)
        params.extend([w, b])
    return tuple(params)


def prepare_kernel_params(params, state_feat, action_feat,
                          compute_dtype=jnp.bfloat16):
    """Split W1 (states/actions halves), zero-pad to lane-dense widths, cast
    MXU operands to bf16.  Biases stay f32 (1, N) for the f32 add/tanh path."""
    w1, b1, w2, b2, w3, b3 = params

    w1s = w1[:state_feat]
    if action_feat > 0:
        w1a = w1[state_feat:state_feat + action_feat]
    else:
        # value_function=True: actions unused; zero dummy keeps the kernel
        # signature fixed (contributes exactly 0 to layer 1).
        w1a = jnp.zeros((8, w1.shape[1]), w1.dtype)

    def pad_to(a, rows, cols):
        return jnp.pad(a, ((0, rows - a.shape[0]), (0, cols - a.shape[1])))

    w1s = pad_to(w1s, w1s.shape[0], HIDDEN_PAD).astype(compute_dtype)
    w1a = pad_to(w1a, w1a.shape[0], HIDDEN_PAD).astype(compute_dtype)
    b1p = pad_to(b1.reshape(1, -1), 1, HIDDEN_PAD)                 # f32
    w2p = pad_to(w2, HIDDEN_PAD, HIDDEN_PAD).astype(compute_dtype)
    b2p = pad_to(b2.reshape(1, -1), 1, HIDDEN_PAD)                 # f32
    w3p = pad_to(w3, HIDDEN_PAD, OUT_PAD).astype(compute_dtype)
    b3p = pad_to(b3.reshape(1, -1), 1, OUT_PAD)                    # f32
    return (w1s, w1a, b1p, w2p, b2p, w3p, b3p)


def central_critic_forward(states, actions, kernel_params, *, out_dim=1,
                           value_function=False, block_b=512,
                           compute_dtype=jnp.bfloat16):
    """Pallas implementation of CentralCritic.forward -> [B, out_dim] f32."""
    w1s, w1a, b1, w2, b2, w3, b3 = kernel_params
    B = states.shape[0]
    S = w1s.shape[0]
    A = w1a.shape[0]

    # TODO(synk): when value_function=True the PyTorch module feeds `states`
    # unflattened to the MLP (Linear broadcasts over leading dims); here we
    # always flatten to [B, S], which matches the usual [B, input_size] usage.
    flat_states = states.reshape(B, -1).astype(compute_dtype)
    if value_function:
        flat_actions = jnp.zeros((B, A), compute_dtype)
    else:
        flat_actions = actions.reshape(B, -1).astype(compute_dtype)
    assert flat_states.shape[1] == S and flat_actions.shape[1] == A

    # Batch tile: multiple of 8 sublanes, sized well under VMEM on v5e/v6e/v7x
    # (activation slab per step ~ block_b * 128 * 4 B; weights are tiny and
    # stay resident).  Pad B up to a whole number of tiles, slice back below.
    tB = min(block_b, _round_up(B, 8))
    B_pad = _round_up(B, tB)
    if B_pad != B:
        flat_states = jnp.pad(flat_states, ((0, B_pad - B), (0, 0)))
        flat_actions = jnp.pad(flat_actions, ((0, B_pad - B), (0, 0)))

    row_spec = lambda d: pl.BlockSpec((tB, d), lambda i: (i, 0))
    fixed = lambda a: pl.BlockSpec(a.shape, lambda i: (0, 0))

    out_padded = pl.pallas_call(
        central_critic_kernel,
        out_shape=jax.ShapeDtypeStruct((B_pad, OUT_PAD), jnp.float32),
        grid=(B_pad // tB,),
        in_specs=[row_spec(S), row_spec(A),
                  fixed(w1s), fixed(w1a), fixed(b1),
                  fixed(w2), fixed(b2), fixed(w3), fixed(b3)],
        out_specs=pl.BlockSpec((tB, OUT_PAD), lambda i: (i, 0)),
        compiler_params=pltpu.CompilerParams(
            dimension_semantics=("parallel",)),
    )(flat_states, flat_actions, w1s, w1a, b1, w2, b2, w3, b3)

    return out_padded[:B, :out_dim]


def reference_forward(states, actions, params, value_function=False):
    """Pure-JAX f32 reference (matches the PyTorch module)."""
    B = states.shape[0]
    x = states.reshape(B, -1)
    if not value_function:
        x = jnp.concatenate([x, actions.reshape(B, -1)], axis=1)
    w1, b1, w2, b2, w3, b3 = params
    h = jnp.tanh(x @ w1 + b1)
    h = jnp.tanh(h @ w2 + b2)
    return h @ w3 + b3


if __name__ == "__main__":
    key = jax.random.PRNGKey(0)

    # Small shapes consistent with the module.
    batch = 2
    state_shape = (4, 4)      # flattens to input_size[0] = 16
    state_feat = 16
    action_size = 4
    hidden_size = 32
    value_function = False    # default path: concat(states, actions) -> MLP

    k1, k2, k3 = jax.random.split(key, 3)
    states = jax.random.normal(k1, (batch,) + state_shape, jnp.float32)
    actions = jax.random.normal(k2, (batch, action_size), jnp.float32)

    in_features = state_feat + action_size * (not value_function)
    params = init_params(k3, in_features, hidden_size, out_features=1)
    kparams = prepare_kernel_params(
        params, state_feat, action_size if not value_function else 0)

    out = central_critic_forward(states, actions, kparams,
                                 value_function=value_function)
    out = jax.block_until_ready(out)

    ref = reference_forward(states, actions, params,
                            value_function=value_function)

    assert out.shape == (batch, 1), out.shape
    # bf16 MXU operands with f32 accumulation vs. pure-f32 reference.
    assert jnp.allclose(out, ref, atol=2e-2, rtol=2e-2), \
        float(jnp.max(jnp.abs(out - ref)))

    print("KERNEL_OK")
</pallas_src>

<mosaic_0001>
module attributes {stable_mosaic.version = 11 : i64} {
  func.func @central_critic_kernel(%arg0: i32, %arg1: memref<8x16xbf16, #tpu.memory_space<vmem>>, %arg2: memref<8x4xbf16, #tpu.memory_space<vmem>>, %arg3: memref<16x128xbf16, #tpu.memory_space<vmem>>, %arg4: memref<4x128xbf16, #tpu.memory_space<vmem>>, %arg5: memref<1x128xf32, #tpu.memory_space<vmem>>, %arg6: memref<128x128xbf16, #tpu.memory_space<vmem>>, %arg7: memref<1x128xf32, #tpu.memory_space<vmem>>, %arg8: memref<128x128xbf16, #tpu.memory_space<vmem>>, %arg9: memref<1x128xf32, #tpu.memory_space<vmem>>, %arg10: memref<8x128xf32, #tpu.memory_space<vmem>>) attributes {dimension_semantics = [#tpu.dimension_semantics<parallel>], iteration_bounds = array<i64: 1>, scalar_prefetch = 0 : i64, scratch_operands = 0 : i64, tpu.core_type = #tpu.core_type<tc>, window_params = [{transform_indices = @transform_0, window_bounds = array<i64: 8, 16>}, {transform_indices = @transform_1, window_bounds = array<i64: 8, 4>}, {pipeline_mode = #tpu.pipeline_mode<synchronous>, transform_indices = @transform_2, window_bounds = array<i64: 16, 128>}, {pipeline_mode = #tpu.pipeline_mode<synchronous>, transform_indices = @transform_3, window_bounds = array<i64: 4, 128>}, {pipeline_mode = #tpu.pipeline_mode<synchronous>, transform_indices = @transform_4, window_bounds = array<i64: 1, 128>}, {pipeline_mode = #tpu.pipeline_mode<synchronous>, transform_indices = @transform_5, window_bounds = array<i64: 128, 128>}, {pipeline_mode = #tpu.pipeline_mode<synchronous>, transform_indices = @transform_6, window_bounds = array<i64: 1, 128>}, {pipeline_mode = #tpu.pipeline_mode<synchronous>, transform_indices = @transform_7, window_bounds = array<i64: 128, 128>}, {pipeline_mode = #tpu.pipeline_mode<synchronous>, transform_indices = @transform_8, window_bounds = array<i64: 1, 128>}, {transform_indices = @transform_9, window_bounds = array<i64: 8, 128>}]} {
    %c0 = arith.constant 0 : index
    %c0_0 = arith.constant 0 : index
    %0 = vector.load %arg1[%c0, %c0_0] : memref<8x16xbf16, #tpu.memory_space<vmem>>, vector<8x16xbf16>
    %c0_1 = arith.constant 0 : index
    %c0_2 = arith.constant 0 : index
    %1 = vector.load %arg3[%c0_1, %c0_2] : memref<16x128xbf16, #tpu.memory_space<vmem>>, vector<16x128xbf16>
    %cst = arith.constant dense<0.000000e+00> : vector<8x128xf32>
    %2 = tpu.matmul %0, %1, %cst {dimension_numbers = #tpu.dot_dimension_numbers<[1], [0], [0], [1], [0, 0, 1, 1], [], []>} : vector<8x16xbf16>, vector<16x128xbf16>, vector<8x128xf32> -> vector<8x128xf32>
    %c0_3 = arith.constant 0 : index
    %c0_4 = arith.constant 0 : index
    %3 = vector.load %arg2[%c0_3, %c0_4] : memref<8x4xbf16, #tpu.memory_space<vmem>>, vector<8x4xbf16>
    %c0_5 = arith.constant 0 : index
    %c0_6 = arith.constant 0 : index
    %4 = vector.load %arg4[%c0_5, %c0_6] : memref<4x128xbf16, #tpu.memory_space<vmem>>, vector<4x128xbf16>
    %cst_7 = arith.constant dense<0.000000e+00> : vector<8x128xf32>
    %5 = tpu.matmul %3, %4, %cst_7 {dimension_numbers = #tpu.dot_dimension_numbers<[1], [0], [0], [1], [0, 0, 1, 1], [], []>} : vector<8x4xbf16>, vector<4x128xbf16>, vector<8x128xf32> -> vector<8x128xf32>
    %6 = arith.addf %2, %5 : vector<8x128xf32>
    %c0_8 = arith.constant 0 : index
    %c0_9 = arith.constant 0 : index
    %7 = vector.load %arg5[%c0_8, %c0_9] : memref<1x128xf32, #tpu.memory_space<vmem>>, vector<1x128xf32>
    %8 = vector.broadcast %7 : vector<1x128xf32> to vector<8x128xf32>
    %9 = arith.addf %6, %8 : vector<8x128xf32>
    %10 = math.tanh %9 : vector<8x128xf32>
    %11 = arith.truncf %10 : vector<8x128xf32> to vector<8x128xbf16>
    %c0_10 = arith.constant 0 : index
    %c0_11 = arith.constant 0 : index
    %12 = vector.load %arg6[%c0_10, %c0_11] : memref<128x128xbf16, #tpu.memory_space<vmem>>, vector<128x128xbf16>
    %cst_12 = arith.constant dense<0.000000e+00> : vector<8x128xf32>
    %13 = tpu.matmul %11, %12, %cst_12 {dimension_numbers = #tpu.dot_dimension_numbers<[1], [0], [0], [1], [0, 0, 1, 1], [], []>} : vector<8x128xbf16>, vector<128x128xbf16>, vector<8x128xf32> -> vector<8x128xf32>
    %c0_13 = arith.constant 0 : index
    %c0_14 = arith.constant 0 : index
    %14 = vector.load %arg7[%c0_13, %c0_14] : memref<1x128xf32, #tpu.memory_space<vmem>>, vector<1x128xf32>
    %15 = vector.broadcast %14 : vector<1x128xf32> to vector<8x128xf32>
    %16 = arith.addf %13, %15 : vector<8x128xf32>
    %17 = math.tanh %16 : vector<8x128xf32>
    %18 = arith.truncf %17 : vector<8x128xf32> to vector<8x128xbf16>
    %c0_15 = arith.constant 0 : index
    %c0_16 = arith.constant 0 : index
    %19 = vector.load %arg8[%c0_15, %c0_16] : memref<128x128xbf16, #tpu.memory_space<vmem>>, vector<128x128xbf16>
    %cst_17 = arith.constant dense<0.000000e+00> : vector<8x128xf32>
    %20 = tpu.matmul %18, %19, %cst_17 {dimension_numbers = #tpu.dot_dimension_numbers<[1], [0], [0], [1], [0, 0, 1, 1], [], []>} : vector<8x128xbf16>, vector<128x128xbf16>, vector<8x128xf32> -> vector<8x128xf32>
    %c0_18 = arith.constant 0 : index
    %c0_19 = arith.constant 0 : index
    %21 = vector.load %arg9[%c0_18, %c0_19] : memref<1x128xf32, #tpu.memory_space<vmem>>, vector<1x128xf32>
    %22 = vector.broadcast %21 : vector<1x128xf32> to vector<8x128xf32>
    %23 = arith.addf %20, %22 : vector<8x128xf32>
    %c0_20 = arith.constant 0 : index
    %c0_21 = arith.constant 0 : index
    %24 = vector.load %arg10[%c0_20, %c0_21] : memref<8x128xf32, #tpu.memory_space<vmem>>, vector<8x128xf32>
    tpu.vector_store %arg10[%c0_20, %c0_21], %23 {strides = array<i32>} : memref<8x128xf32, #tpu.memory_space<vmem>>, vector<8x128xf32>,
    return
  }
  func.func @transform_0(%arg0: i32) -> (i32, i32) {
    %c0_i32 = arith.constant 0 : i32
    %c0_i32_0 = arith.constant 0 : i32
    return %arg0, %c0_i32 : i32, i32
  }
  func.func @transform_1(%arg0: i32) -> (i32, i32) {
    %c0_i32 = arith.constant 0 : i32
    %c0_i32_0 = arith.constant 0 : i32
    return %arg0, %c0_i32 : i32, i32
  }
  func.func @transform_2(%arg0: i32) -> (i32, i32) {
    %c0_i32 = arith.constant 0 : i32
    %c0_i32_0 = arith.constant 0 : i32
    %c0_i32_1 = arith.constant 0 : i32
    return %c0_i32, %c0_i32_0 : i32, i32
  }
  func.func @transform_3(%arg0: i32) -> (i32, i32) {
    %c0_i32 = arith.constant 0 : i32
    %c0_i32_0 = arith.constant 0 : i32
    %c0_i32_1 = arith.constant 0 : i32
    return %c0_i32, %c0_i32_0 : i32, i32
  }
  func.func @transform_4(%arg0: i32) -> (i32, i32) {
    %c0_i32 = arith.constant 0 : i32
    %c0_i32_0 = arith.constant 0 : i32
    %c0_i32_1 = arith.constant 0 : i32
    return %c0_i32, %c0_i32_0 : i32, i32
  }
  func.func @transform_5(%arg0: i32) -> (i32, i32) {
    %c0_i32 = arith.constant 0 : i32
    %c0_i32_0 = arith.constant 0 : i32
    %c0_i32_1 = arith.constant 0 : i32
    return %c0_i32, %c0_i32_0 : i32, i32
  }
  func.func @transform_6(%arg0: i32) -> (i32, i32) {
    %c0_i32 = arith.constant 0 : i32
    %c0_i32_0 = arith.constant 0 : i32
    %c0_i32_1 = arith.constant 0 : i32
    return %c0_i32, %c0_i32_0 : i32, i32
  }
  func.func @transform_7(%arg0: i32) -> (i32, i32) {
    %c0_i32 = arith.constant 0 : i32
    %c0_i32_0 = arith.constant 0 : i32
    %c0_i32_1 = arith.constant 0 : i32
    return %c0_i32, %c0_i32_0 : i32, i32
  }
  func.func @transform_8(%arg0: i32) -> (i32, i32) {
    %c0_i32 = arith.constant 0 : i32
    %c0_i32_0 = arith.constant 0 : i32
    %c0_i32_1 = arith.constant 0 : i32
    return %c0_i32, %c0_i32_0 : i32, i32
  }
  func.func @transform_9(%arg0: i32) -> (i32, i32) {
    %c0_i32 = arith.constant 0 : i32
    %c0_i32_0 = arith.constant 0 : i32
    return %arg0, %c0_i32 : i32, i32
  }
}

</mosaic_0001>

<bundles_post_ra>
// kernel: tpu_custom_call.1
= control target key start
LH: loop header
LB: loop body
LE: loop exit
PB: predicated region body
PF: predicated region fallthrough
CT: control target
= control target key end

     0   :  { %14 = vsyncpa [#allocation3], 0  ;;  %s752_s0 = inlined_call_operand.vmem [shape: bf16[8,16], index: 0, kind: input, shape index: {}]   ;;  %s753_s1 = inlined_call_operand.vmem [shape: bf16[8,4], index: 1, kind: input, shape index: {}]   ;;  %s754_s2 = inlined_call_operand.vmem [shape: bf16[16,128], index: 2, kind: input, shape index: {}]   ;;  %s755_s3 = inlined_call_operand.vmem [shape: bf16[4,128], index: 3, kind: input, shape index: {}]   ;;  %s756_s4 = inlined_call_operand.vmem [shape: f32[1,128], index: 4, kind: input, shape index: {}]   ;;  %s757_s5 = inlined_call_operand.hbm [shape: bf16[128,128], index: 5, kind: input, shape index: {}]   ;;  %s758_s6 = inlined_call_operand.vmem [shape: f32[1,128], index: 6, kind: input, shape index: {}]   ;;  %s759_s7 = inlined_call_operand.hbm [shape: bf16[128,128], index: 7, kind: input, shape index: {}]   ;;  %s760_s8 = inlined_call_operand.vmem [shape: f32[1,128], index: 8, kind: input, shape index: {}]   ;;  %s761_s9 = inlined_call_operand.hbm [shape: f32[8,128], index: 9, kind: output, shape index: {}]  }
   0x1   :  { %15 = vsyncpa [#allocation6], 0 }
   0x2   :  { %16 = vsyncpa [#allocation4], 0  ;;  %s612_s30 = smov [#allocation2]   ;;  %s540_s13 = scalar_lea.hbm %s757_s5, 1024 }
   0x3   :  { %s32_s10 = sshll.u32 %s612_s30, 4  ;;  %p541_p0 = scmp.ne.s32.totalorder %s757_s5, %s540_s13  ;;  %s33_s10 = int_to_ptr.vmem [resolvable:$true] %s32_s10 }
   0x4   :  { %p544_p1 = scmp.lt.u32.totalorder %s540_s13, %s757_s5 }
   0x6   :  { %p546_p2 = pnand %p544_p1, %p541_p0 }
   0x8   :  { %549 = shalt.err (!%p546_p2)
}
   0x9   :  { %s550_s18 = scalar_lea.vmem %s33_s10, 1024  ;;  %p555_p4 = scmp.lt.s32.totalorder %s33_s10, %s33_s10 }
   0xa   :  { %p551_p3 = scmp.ne.s32.totalorder %s33_s10, %s550_s18  ;;  %p556_p5 = scmp.lt.s32.totalorder %s550_s18, %s550_s18 }
   0xc   :  { %p557_p6 = por %p556_p5, %p555_p4 }
   0xe   :  { %p558_p7 = pnand %p557_p6, %p551_p3 }
  0x10   :  { %561 = shalt.err (!%p558_p7)
}
  0x11   :  { %s613_s19 = smov 64   ;;  %s614_s20 = smov 4  }
  0x12   :  { %38 = dma.hbm_to_vmem [thread:$0]  %s757_s5, 1024, %s33_s10, [#allocation3], %s613_s19, %s613_s19, %s614_s20  }
  0x13   :  { %s615_s23 = smov [#allocation5]   ;;  %s562_s27 = scalar_lea.hbm %s759_s7, 1024 }
  0x14   :  { %s46_s24 = sshll.u32 %s615_s23, 4  ;;  %p563_p8 = scmp.ne.s32.totalorder %s759_s7, %s562_s27  ;;  %s47_s24 = int_to_ptr.vmem [resolvable:$true] %s46_s24 }
  0x15   :  { %p566_p9 = scmp.lt.u32.totalorder %s562_s27, %s759_s7 }
  0x17   :  { %p568_p10 = pnand %p566_p9, %p563_p8 }
  0x19   :  { %571 = shalt.err (!%p568_p10)
}
  0x1a   :  { %s572_s12 = scalar_lea.vmem %s47_s24, 1024  ;;  %p577_p12 = scmp.lt.s32.totalorder %s47_s24, %s47_s24 }
  0x1b   :  { %p573_p11 = scmp.ne.s32.totalorder %s47_s24, %s572_s12  ;;  %p578_p13 = scmp.lt.s32.totalorder %s572_s12, %s572_s12 }
  0x1d   :  { %p579_p0 = por %p578_p13, %p577_p12 }
  0x1f   :  { %p580_p1 = pnand %p579_p0, %p573_p11 }
  0x21   :  { %583 = shalt.err (!%p580_p1)
}
  0x22   :  { %52 = dma.hbm_to_vmem [thread:$0]  %s759_s7, 1024, %s47_s24, [#allocation6], %s613_s19, %s613_s19, %s614_s20  }
  0x23   :  { %606 = dma.done.wait [#allocation3], 1024  }
  0x24   :  { %607 = vsyncadd [#allocation3], 4294966272 }
  0x25   :  { %608 = dma.done.wait [#allocation6], 1024  }
  0x26   :  { %609 = vsyncadd [#allocation6], 4294966272  ;;  %v616_v0 = vmov 0.0   ;;  %vm617_vm0 = vmmov 0   ;;  %vm71_vm1 = vcmask 1041408   ;;  %v519_v3 = vld [vmem:[%s754_s2] sm:$0xff]  }
  0x27   :  { %460 = vmatprep.subr.bf16.mxu0 %v616_v0  ;;  %466 = vmatprep.subr.bf16.mxu1 %v616_v0  ;;  %v66_v1 = vld [vmem:[%s755_s3] sm:$0x3]  ;;  %vm67_vm2 = vcmask 31744   ;;  %vm121_vm3 = vcmask 130048   ;;  %v521_v7 = vld [vmem:[#allocation2 + $0x8] sm:$0xff]   ;;  %v522_v8 = vld [vmem:[#allocation2 + $0x10] sm:$0xff]  }
  0x28   :  { %462 = vmatprep.mubr.msk.bf16.mxu0 %vm617_vm0, %v616_v0  ;;  %468 = vmatprep.mubr.msk.bf16.mxu1 %vm617_vm0, %v616_v0  ;;  %v73_v2 = vsel %vm71_vm1, %v66_v1, 0  ;;  %v65_v4 = vld [vmem:[%s753_s1] sm:$0xf]  ;;  %v523_v9 = vld [vmem:[#allocation2 + $0x18] sm:$0xff]   ;;  %v525_v11 = vld [vmem:[#allocation2 + $0x28] sm:$0xff]   ;;  %s618_s21 = smov [#allocation7]  }
  0x29   :  { %461 = vmatpush3.bf16.msra.mxu0 %v73_v2  ;;  %v520_v5 = vld [vmem:[#allocation2] sm:$0xff]   ;;  %467 = vmatpush3.bf16.msra.mxu1 %v519_v3  ;;  %v526_v12 = vld [vmem:[#allocation2 + $0x30] sm:$0xff]   ;;  %v527_v13 = vld [vmem:[#allocation2 + $0x38] sm:$0xff]   ;;  %s406_s22 = sshll.u32 %s618_s21, 4  ;;  %s407_s22 = int_to_ptr.vmem [resolvable:$true] %s406_s22 }
  0x2a   :  { %v62_v6 = vld [vmem:[%s752_s0] sm:$0xf]  ;;  %472 = vmatprep.subr.bf16.mxu0 %v616_v0  ;;  %492 = vmatprep.subr.bf16.mxu1 %v616_v0  ;;  %v529_v15 = vld [vmem:[#allocation5 + $0x8] sm:$0xff]   ;;  %v530_v16 = vld [vmem:[#allocation5 + $0x10] sm:$0xff]   ;;  %p589_p3 = scmp.lt.s32.totalorder %s407_s22, %s407_s22 }
  0x2b   :  { %v524_v10 = vld [vmem:[#allocation2 + $0x20] sm:$0xff]   ;;  %v531_v17 = vld [vmem:[#allocation5 + $0x18] sm:$0xff]   ;;  %v533_v32 = vld [vmem:[#allocation5 + $0x28] sm:$0xff]  }
  0x2c   :  { %463 = vmatmul.mubr.msk.bf16.vlgmr.msra.gmra.mrb[0].mxu0 %vm67_vm2, %v65_v4  ;;  %469 = vmatmul.mubr.msk.bf16.vlgmr.msra.gmra.mrb[0].mxu1 %vm121_vm3, %v62_v6  ;;  %v528_v14 = vld [vmem:[#allocation5] sm:$0xff]   ;;  %v534_v33 = vld [vmem:[#allocation5 + $0x30] sm:$0xff]   ;;  %v535_v34 = vld [vmem:[#allocation5 + $0x38] sm:$0xff]  }
  0x2d   :  { %473 = vmatpush3.bf16.msra.mxu0 %v520_v5  ;;  %488 = vmatprep.mubr.msk.bf16.mxu0 %vm617_vm0, %v616_v0  ;;  %v419_v21 = vld [vmem:[%s756_s4] ss:$0 sm:$0xff] }
  0x2e   :  { %474 = vmatprep.subr.bf16.mxu0 %v616_v0  ;;  %508 = vmatprep.mubr.msk.bf16.mxu1 %vm617_vm0, %v616_v0  ;;  %v532_v31 = vld [vmem:[#allocation5 + $0x20] sm:$0xff]  }
  0x2f   :  { %493 = vmatpush3.bf16.msra.mxu1 %v528_v14  ;;  %v420_v35 = vld [vmem:[%s758_s6] ss:$0 sm:$0xff]  ;;  %s584_s6 = scalar_lea.vmem %s407_s22, 128 }
  0x30   :  { %494 = vmatprep.subr.bf16.mxu1 %v616_v0  ;;  %v429_v43 = vld [vmem:[%s760_s8] ss:$0 sm:$0xff]  ;;  %p585_p2 = scmp.ne.s32.totalorder %s407_s22, %s584_s6  ;;  %p590_p4 = scmp.lt.s32.totalorder %s584_s6, %s584_s6 }
  0x31   :  { %475 = vmatpush3.bf16.msra.mxu0 %v521_v7 }
  0x32   :  { %476 = vmatprep.subr.bf16.mxu0 %v616_v0  ;;  %p591_p5 = por %p590_p4, %p589_p3 }
  0x33   :  { %495 = vmatpush3.bf16.msra.mxu1 %v529_v15 }
  0x34   :  { %496 = vmatprep.subr.bf16.mxu1 %v616_v0  ;;  %p592_p6 = pnand %p591_p5, %p585_p2 }
  0x35   :  { %477 = vmatpush3.bf16.msra.mxu0 %v522_v8 }
  0x36   :  { %478 = vmatprep.subr.bf16.mxu0 %v616_v0 }
  0x37   :  { %497 = vmatpush3.bf16.msra.mxu1 %v530_v16 }
  0x38   :  { %498 = vmatprep.subr.bf16.mxu1 %v616_v0 }
  0x39   :  { %479 = vmatpush3.bf16.msra.mxu0 %v523_v9 }
  0x3a   :  { %480 = vmatprep.subr.bf16.mxu0 %v616_v0 }
  0x3b   :  { %499 = vmatpush3.bf16.msra.mxu1 %v531_v17 }
  0x3c   :  { %500 = vmatprep.subr.bf16.mxu1 %v616_v0 }
  0x3d   :  { %481 = vmatpush3.bf16.msra.mxu0 %v524_v10 }
  0x3e   :  { %482 = vmatprep.subr.bf16.mxu0 %v616_v0 }
  0x3f   :  { %501 = vmatpush3.bf16.msra.mxu1 %v532_v31 }
  0x40   :  { %502 = vmatprep.subr.bf16.mxu1 %v616_v0 }
  0x41   :  { %483 = vmatpush3.bf16.msra.mxu0 %v525_v11 }
  0x42   :  { %484 = vmatprep.subr.bf16.mxu0 %v616_v0 }
  0x43   :  { %503 = vmatpush3.bf16.msra.mxu1 %v533_v32 }
  0x44   :  { %504 = vmatprep.subr.bf16.mxu1 %v616_v0 }
  0x45   :  { %485 = vmatpush3.bf16.msra.mxu0 %v526_v12 }
  0x46   :  { %486 = vmatprep.subr.bf16.mxu0 %v616_v0 }
  0x47   :  { %505 = vmatpush3.bf16.msra.mxu1 %v534_v33 }
  0x48   :  { %506 = vmatprep.subr.bf16.mxu1 %v616_v0 }
  0x49   :  { %487 = vmatpush3.bf16.msra.mxu0 %v527_v13 }
  0x4b   :  { %507 = vmatpush3.bf16.msra.mxu1 %v535_v34 }
  0xff   :  { %v109_v18 = vpop.f32.mrb[0].mxu0  ;;  %v159_v20 = vpop.f32.mrb[0].mxu1 }
 0x100   :  { %v464_v19 = vpop.f32.mrb[1].mxu0  ;;  %v160_v22 = vadd.f32 %v159_v20, %v109_v18  ;;  %v470_v24 = vpop.f32.mrb[1].mxu1 }
 0x101   :  { %v112_v23 = vpop.f32.mrb[2].mxu0  ;;  %v162_v26 = vpop.f32.mrb[2].mxu1 }
 0x102   :  { %v465_v25 = vpop.f32.mrb[3].mxu0  ;;  %v172_v27 = vadd.f32 %v419_v21, %v160_v22  ;;  %v471_v28 = vpop.f32.mrb[3].mxu1 }
 0x104   :  { %536 = vtanh.f32 %v172_v27 }
 0x10e   :  { %v537_v29 = vpop.eup %536 }
 0x10f   :  { %v174_v30 = vpack.c.bf16 %v537_v29, %v537_v29 }
 0x111   :  { %489 = vmatmul.mubr.bf16.vlgmr.msra.gmra.mrb[4].mxu0 %v174_v30 }
 0x1e4   :  { %v280_v36 = vpop.f32.mrb[4].mxu0 }
 0x1e5   :  { %v281_v37 = vadd.f32 %v420_v35, %v280_v36  ;;  %v490_v38 = vpop.f32.mrb[5].mxu0 }
 0x1e6   :  { %v283_v39 = vpop.f32.mrb[6].mxu0 }
 0x1e7   :  { %538 = vtanh.f32 %v281_v37  ;;  %v491_v40 = vpop.f32.mrb[7].mxu0 }
 0x1f1   :  { %v539_v41 = vpop.eup %538 }
 0x1f2   :  { %v287_v42 = vpack.c.bf16 %v539_v41, %v539_v41 }
 0x1f4   :  { %509 = vmatmul.mubr.bf16.vlgmr.msra.gmra.mrb[4].mxu1 %v287_v42 }
 0x2c7   :  { %v393_v44 = vpop.f32.mrb[4].mxu1 }
 0x2c8   :  { %v394_v45 = vadd.f32 %v429_v43, %v393_v44  ;;  %v510_v46 = vpop.f32.mrb[5].mxu1 }
 0x2c9   :  { %v396_v47 = vpop.f32.mrb[6].mxu1 }
 0x2ca   :  { %399 = vst [vmem:[#allocation7] sm:$0xff] %v394_v45  ;;  %v511_v48 = vpop.f32.mrb[7].mxu1 }
 0x2cb   :  { %595 = shalt.err (!%p592_p6)
}
 0x2cc   :  { %s596_s8 = scalar_lea.hbm %s761_s9, 128 }
 0x2cd   :  { %p597_p7 = scmp.ne.s32.totalorder %s761_s9, %s596_s8  ;;  %p600_p8 = scmp.lt.u32.totalorder %s596_s8, %s761_s9 }
 0x2cf   :  { %p602_p9 = pnand %p600_p8, %p597_p7 }
 0x2d1   :  { %605 = shalt.err (!%p602_p9)
}
 0x2d2   :  { %409 = dma.vmem_to_hbm [thread:$0]  %s407_s22, 128, %s761_s9, [#allocation4]  }
 0x2d3   :  { %610 = dma.done.wait [#allocation4], 128  }
 0x2d4   :  { %611 = vsyncadd [#allocation4], 4294967168 }
 0x2d5   :  { %413 = vsyncpa [#allocation3], 1 }
 0x2d6   :  { %414 = vsyncpa [#allocation6], 1 }
 0x2d7   :  { %415 = vsyncpa [#allocation4], 1 }

</bundles_post_ra>
